<compile_context>
chip_gen: v5e
topology: v5e:2x2
jax: 0.10.0
libtpu: 0.0.40
codegen_flags: <defaults>
</compile_context>

<pallas_src>
import functools

import jax
import jax.numpy as jnp
from jax.experimental import pallas as pl
from jax.experimental.pallas import tpu as pltpu

LANE = 128           # pad every feature dimension to one full lane width
SUBLANE = 8          # f32 sublane count; pad batch to a multiple of this
NUM_LAYERS = 6
TILE_B = 512         # batch rows per grid block (multiple of 256 -> fills v6e/v7x MXU rows)
SMALL_BATCH_MAX = 1024  # below this, skip the grid entirely (latency path)


def fused_mlp_kernel(x_ref, w_ref, b_ref, o_ref):
    # x_ref: (tile_b, 128) f32     activations (lane-dense, zero-padded)
    # w_ref: (6, 128, 128) bf16    per-layer fused weights (BN scale folded in)
    # b_ref: (6, 1, 128)   f32     per-layer fused biases  (BN shift folded in)
    # o_ref: (tile_b, 128) f32     final (padded) activations
    h = x_ref[...]
    for li in range(NUM_LAYERS):                        # static unroll: 6 MXU matmuls
        z = jnp.dot(h.astype(jnp.bfloat16), w_ref[li],  # bf16 inputs, f32 accumulation
                    preferred_element_type=jnp.float32)
        z = z + b_ref[li]
        h = jnp.maximum(z, 0.0)                         # ReLU (padded lanes stay 0)
    o_ref[...] = h.astype(o_ref.dtype)


def _cost_estimate(bp):
    flops = 2 * NUM_LAYERS * bp * LANE * LANE
    bytes_accessed = (bp * LANE * 4                       # x in (f32)
                      + NUM_LAYERS * LANE * LANE * 2      # weights (bf16)
                      + NUM_LAYERS * LANE * 4             # bias (f32)
                      + bp * LANE * 4)                    # out (f32)
    return pl.CostEstimate(flops=flops, transcendentals=0,
                           bytes_accessed=bytes_accessed)


def fused_mlp_small(x_pad, w_stack, b_stack):
    """Latency path: whole problem as one VMEM-resident block, no grid."""
    Bp, P = x_pad.shape
    return pl.pallas_call(
        fused_mlp_kernel,
        out_shape=jax.ShapeDtypeStruct((Bp, P), jnp.float32),
        in_specs=[
            pl.BlockSpec(memory_space=pltpu.MemorySpace.VMEM),
            pl.BlockSpec(memory_space=pltpu.MemorySpace.VMEM),
            pl.BlockSpec(memory_space=pltpu.MemorySpace.VMEM),
        ],
        out_specs=pl.BlockSpec(memory_space=pltpu.MemorySpace.VMEM),
        cost_estimate=_cost_estimate(Bp),
    )(x_pad, w_stack, b_stack)


def fused_mlp_gridded(x_pad, w_stack, b_stack, tile_b):
    """Throughput path: 1-D parallel batch grid; weights/bias stay resident across blocks."""
    Bp, P = x_pad.shape
    assert Bp % tile_b == 0
    return pl.pallas_call(
        fused_mlp_kernel,
        out_shape=jax.ShapeDtypeStruct((Bp, P), jnp.float32),
        grid=(Bp // tile_b,),
        in_specs=[
            pl.BlockSpec((tile_b, LANE), lambda i: (i, 0)),
            pl.BlockSpec((NUM_LAYERS, LANE, LANE), lambda i: (0, 0, 0)),
            pl.BlockSpec((NUM_LAYERS, 1, LANE), lambda i: (0, 0, 0)),
        ],
        out_specs=pl.BlockSpec((tile_b, LANE), lambda i: (i, 0)),
        compiler_params=pltpu.CompilerParams(
            dimension_semantics=("parallel",)),
        cost_estimate=_cost_estimate(Bp),
    )(x_pad, w_stack, b_stack)


@functools.partial(jax.jit, static_argnames=("out_features",))
def drink_classifier_forward(x, w_stack, b_stack, out_features):
    B, F = x.shape
    if B <= SMALL_BATCH_MAX:
        Bp = ((B + SUBLANE - 1) // SUBLANE) * SUBLANE
        x_pad = jnp.zeros((Bp, LANE), jnp.float32).at[:B, :F].set(x)
        out_pad = fused_mlp_small(x_pad, w_stack, b_stack)
    else:
        Bp = ((B + TILE_B - 1) // TILE_B) * TILE_B
        x_pad = jnp.zeros((Bp, LANE), jnp.float32).at[:B, :F].set(x)
        out_pad = fused_mlp_gridded(x_pad, w_stack, b_stack, TILE_B)
    return out_pad[:B, :out_features]


def init_params(key, dims, eps=1e-5):
    """dims = [in, h1, h2, h3, h4, h5, out].

    Returns:
      w_stack: (6, 128, 128) bf16 — zero-padded, BN-folded weights (layout: x @ W).
      b_stack: (6, 1, 128)   f32  — zero-padded, BN-folded biases.
      layers:  list of (w_fused_bf16, b_fused_f32) unpadded, for the pure-JAX reference.
    """
    n_layers = len(dims) - 1
    assert n_layers == NUM_LAYERS
    keys = jax.random.split(key, 2 * n_layers)

    w_stack = jnp.zeros((n_layers, LANE, LANE), jnp.bfloat16)
    b_stack = jnp.zeros((n_layers, 1, LANE), jnp.float32)
    layers = []

    for li in range(n_layers):
        fan_in, fan_out = dims[li], dims[li + 1]
        # xavier_normal_ on torch weight of shape (out, in)
        std = jnp.sqrt(2.0 / (fan_in + fan_out))
        w = std * jax.random.normal(keys[2 * li], (fan_out, fan_in), dtype=jnp.float32)
        # nn.Linear default bias init: U(-1/sqrt(fan_in), 1/sqrt(fan_in))
        bound = 1.0 / jnp.sqrt(jnp.float32(fan_in))
        b = jax.random.uniform(keys[2 * li + 1], (fan_out,),
                               minval=-bound, maxval=bound, dtype=jnp.float32)

        if li < n_layers - 1:
            # Fresh BatchNorm1d (eval mode): gamma=1, beta=0, mean=0, var=1
            gamma = jnp.ones((fan_out,), jnp.float32)
            beta = jnp.zeros((fan_out,), jnp.float32)
            running_mean = jnp.zeros((fan_out,), jnp.float32)
            running_var = jnp.ones((fan_out,), jnp.float32)
            scale = gamma / jnp.sqrt(running_var + eps)
            shift = beta - running_mean * scale
        else:
            # Final layer has no BatchNorm -> identity affine
            scale = jnp.ones((fan_out,), jnp.float32)
            shift = jnp.zeros((fan_out,), jnp.float32)

        # Fold BN + bias into the weights:  y = (x @ W^T + b) * scale + shift
        #                                     = x @ (W^T * scale) + (b * scale + shift)
        w_t = jnp.transpose(w)                          # (in, out)
        w_fused = (w_t * scale[None, :]).astype(jnp.bfloat16)
        b_fused = b * scale + shift

        w_stack = w_stack.at[li, :fan_in, :fan_out].set(w_fused)
        b_stack = b_stack.at[li, 0, :fan_out].set(b_fused)
        layers.append((w_fused, b_fused))

    return w_stack, b_stack, layers


def reference_forward(x, layers):
    """Pure-JAX reference (same eval-mode math: bf16 matmul inputs, f32 accumulation)."""
    h = x.astype(jnp.float32)
    for w_bf16, b_f32 in layers:
        z = jnp.dot(h.astype(jnp.bfloat16), w_bf16,
                    preferred_element_type=jnp.float32) + b_f32
        h = jnp.maximum(z, 0.0)
    return h


if __name__ == "__main__":
    key = jax.random.PRNGKey(0)
    k_params, k_x_small, k_x_big = jax.random.split(key, 3)

    # Shapes consistent with the module's constructor
    dims = [32, 64, 64, 48, 32, 32, 8]   # in, hid1..hid5, out
    w_stack, b_stack, layers = init_params(k_params, dims)

    # --- small-batch latency path (no grid) ---
    batch = 8
    x = jax.random.normal(k_x_small, (batch, dims[0]), dtype=jnp.float32)
    out = drink_classifier_forward(x, w_stack, b_stack, dims[-1])
    jax.block_until_ready(out)
    assert out.shape == (batch, dims[-1])
    assert bool(jnp.all(out >= 0.0))  # final ReLU
    ref = reference_forward(x, layers)
    assert jnp.allclose(out, ref, rtol=1e-3, atol=1e-3), "small-batch mismatch vs reference"

    # --- gridded throughput path (parallel batch grid) ---
    big_batch = 2048
    xb = jax.random.normal(k_x_big, (big_batch, dims[0]), dtype=jnp.float32)
    out_b = drink_classifier_forward(xb, w_stack, b_stack, dims[-1])
    jax.block_until_ready(out_b)
    assert out_b.shape == (big_batch, dims[-1])
    ref_b = reference_forward(xb, layers)
    assert jnp.allclose(out_b, ref_b, rtol=1e-3, atol=1e-3), "gridded mismatch vs reference"

    print("KERNEL_OK")
</pallas_src>

<mosaic_0001>
module attributes {stable_mosaic.version = 11 : i64} {
  func.func @fused_mlp_kernel(%arg0: memref<8x128xf32, #tpu.memory_space<vmem>>, %arg1: memref<6x128x128xbf16, #tpu.memory_space<vmem>>, %arg2: memref<6x1x128xf32, #tpu.memory_space<vmem>>, %arg3: memref<8x128xf32, #tpu.memory_space<vmem>>) attributes {dimension_semantics = [], scalar_prefetch = 0 : i64, scratch_operands = 0 : i64, tpu.core_type = #tpu.core_type<tc>} {
    %c0 = arith.constant 0 : index
    %c0_0 = arith.constant 0 : index
    %0 = vector.load %arg0[%c0, %c0_0] : memref<8x128xf32, #tpu.memory_space<vmem>>, vector<8x128xf32>
    %1 = arith.truncf %0 : vector<8x128xf32> to vector<8x128xbf16>
    %c0_1 = arith.constant 0 : index
    %c0_2 = arith.constant 0 : index
    %c0_3 = arith.constant 0 : index
    %2 = vector.load %arg1[%c0_1, %c0_2, %c0_3] : memref<6x128x128xbf16, #tpu.memory_space<vmem>>, vector<1x128x128xbf16>
    %3 = vector.shape_cast %2 : vector<1x128x128xbf16> to vector<128x128xbf16>
    %cst = arith.constant dense<0.000000e+00> : vector<8x128xf32>
    %4 = tpu.matmul %1, %3, %cst {dimension_numbers = #tpu.dot_dimension_numbers<[1], [0], [0], [1], [0, 0, 1, 1], [], []>} : vector<8x128xbf16>, vector<128x128xbf16>, vector<8x128xf32> -> vector<8x128xf32>
    %c0_4 = arith.constant 0 : index
    %c0_5 = arith.constant 0 : index
    %c0_6 = arith.constant 0 : index
    %5 = vector.load %arg2[%c0_4, %c0_5, %c0_6] : memref<6x1x128xf32, #tpu.memory_space<vmem>>, vector<1x1x128xf32>
    %6 = vector.shape_cast %5 : vector<1x1x128xf32> to vector<1x128xf32>
    %7 = vector.broadcast %6 : vector<1x128xf32> to vector<8x128xf32>
    %8 = arith.addf %4, %7 : vector<8x128xf32>
    %cst_7 = arith.constant 0.000000e+00 : f32
    %9 = vector.broadcast %cst_7 : f32 to vector<8x128xf32>
    %10 = arith.maximumf %8, %9 : vector<8x128xf32>
    %11 = arith.truncf %10 : vector<8x128xf32> to vector<8x128xbf16>
    %c1 = arith.constant 1 : index
    %c0_8 = arith.constant 0 : index
    %c0_9 = arith.constant 0 : index
    %12 = vector.load %arg1[%c1, %c0_8, %c0_9] : memref<6x128x128xbf16, #tpu.memory_space<vmem>>, vector<1x128x128xbf16>
    %13 = vector.shape_cast %12 : vector<1x128x128xbf16> to vector<128x128xbf16>
    %cst_10 = arith.constant dense<0.000000e+00> : vector<8x128xf32>
    %14 = tpu.matmul %11, %13, %cst_10 {dimension_numbers = #tpu.dot_dimension_numbers<[1], [0], [0], [1], [0, 0, 1, 1], [], []>} : vector<8x128xbf16>, vector<128x128xbf16>, vector<8x128xf32> -> vector<8x128xf32>
    %c1_11 = arith.constant 1 : index
    %c0_12 = arith.constant 0 : index
    %c0_13 = arith.constant 0 : index
    %15 = vector.load %arg2[%c1_11, %c0_12, %c0_13] : memref<6x1x128xf32, #tpu.memory_space<vmem>>, vector<1x1x128xf32>
    %16 = vector.shape_cast %15 : vector<1x1x128xf32> to vector<1x128xf32>
    %17 = vector.broadcast %16 : vector<1x128xf32> to vector<8x128xf32>
    %18 = arith.addf %14, %17 : vector<8x128xf32>
    %cst_14 = arith.constant 0.000000e+00 : f32
    %19 = vector.broadcast %cst_14 : f32 to vector<8x128xf32>
    %20 = arith.maximumf %18, %19 : vector<8x128xf32>
    %21 = arith.truncf %20 : vector<8x128xf32> to vector<8x128xbf16>
    %c2 = arith.constant 2 : index
    %c0_15 = arith.constant 0 : index
    %c0_16 = arith.constant 0 : index
    %22 = vector.load %arg1[%c2, %c0_15, %c0_16] : memref<6x128x128xbf16, #tpu.memory_space<vmem>>, vector<1x128x128xbf16>
    %23 = vector.shape_cast %22 : vector<1x128x128xbf16> to vector<128x128xbf16>
    %cst_17 = arith.constant dense<0.000000e+00> : vector<8x128xf32>
    %24 = tpu.matmul %21, %23, %cst_17 {dimension_numbers = #tpu.dot_dimension_numbers<[1], [0], [0], [1], [0, 0, 1, 1], [], []>} : vector<8x128xbf16>, vector<128x128xbf16>, vector<8x128xf32> -> vector<8x128xf32>
    %c2_18 = arith.constant 2 : index
    %c0_19 = arith.constant 0 : index
    %c0_20 = arith.constant 0 : index
    %25 = vector.load %arg2[%c2_18, %c0_19, %c0_20] : memref<6x1x128xf32, #tpu.memory_space<vmem>>, vector<1x1x128xf32>
    %26 = vector.shape_cast %25 : vector<1x1x128xf32> to vector<1x128xf32>
    %27 = vector.broadcast %26 : vector<1x128xf32> to vector<8x128xf32>
    %28 = arith.addf %24, %27 : vector<8x128xf32>
    %cst_21 = arith.constant 0.000000e+00 : f32
    %29 = vector.broadcast %cst_21 : f32 to vector<8x128xf32>
    %30 = arith.maximumf %28, %29 : vector<8x128xf32>
    %31 = arith.truncf %30 : vector<8x128xf32> to vector<8x128xbf16>
    %c3 = arith.constant 3 : index
    %c0_22 = arith.constant 0 : index
    %c0_23 = arith.constant 0 : index
    %32 = vector.load %arg1[%c3, %c0_22, %c0_23] : memref<6x128x128xbf16, #tpu.memory_space<vmem>>, vector<1x128x128xbf16>
    %33 = vector.shape_cast %32 : vector<1x128x128xbf16> to vector<128x128xbf16>
    %cst_24 = arith.constant dense<0.000000e+00> : vector<8x128xf32>
    %34 = tpu.matmul %31, %33, %cst_24 {dimension_numbers = #tpu.dot_dimension_numbers<[1], [0], [0], [1], [0, 0, 1, 1], [], []>} : vector<8x128xbf16>, vector<128x128xbf16>, vector<8x128xf32> -> vector<8x128xf32>
    %c3_25 = arith.constant 3 : index
    %c0_26 = arith.constant 0 : index
    %c0_27 = arith.constant 0 : index
    %35 = vector.load %arg2[%c3_25, %c0_26, %c0_27] : memref<6x1x128xf32, #tpu.memory_space<vmem>>, vector<1x1x128xf32>
    %36 = vector.shape_cast %35 : vector<1x1x128xf32> to vector<1x128xf32>
    %37 = vector.broadcast %36 : vector<1x128xf32> to vector<8x128xf32>
    %38 = arith.addf %34, %37 : vector<8x128xf32>
    %cst_28 = arith.constant 0.000000e+00 : f32
    %39 = vector.broadcast %cst_28 : f32 to vector<8x128xf32>
    %40 = arith.maximumf %38, %39 : vector<8x128xf32>
    %41 = arith.truncf %40 : vector<8x128xf32> to vector<8x128xbf16>
    %c4 = arith.constant 4 : index
    %c0_29 = arith.constant 0 : index
    %c0_30 = arith.constant 0 : index
    %42 = vector.load %arg1[%c4, %c0_29, %c0_30] : memref<6x128x128xbf16, #tpu.memory_space<vmem>>, vector<1x128x128xbf16>
    %43 = vector.shape_cast %42 : vector<1x128x128xbf16> to vector<128x128xbf16>
    %cst_31 = arith.constant dense<0.000000e+00> : vector<8x128xf32>
    %44 = tpu.matmul %41, %43, %cst_31 {dimension_numbers = #tpu.dot_dimension_numbers<[1], [0], [0], [1], [0, 0, 1, 1], [], []>} : vector<8x128xbf16>, vector<128x128xbf16>, vector<8x128xf32> -> vector<8x128xf32>
    %c4_32 = arith.constant 4 : index
    %c0_33 = arith.constant 0 : index
    %c0_34 = arith.constant 0 : index
    %45 = vector.load %arg2[%c4_32, %c0_33, %c0_34] : memref<6x1x128xf32, #tpu.memory_space<vmem>>, vector<1x1x128xf32>
    %46 = vector.shape_cast %45 : vector<1x1x128xf32> to vector<1x128xf32>
    %47 = vector.broadcast %46 : vector<1x128xf32> to vector<8x128xf32>
    %48 = arith.addf %44, %47 : vector<8x128xf32>
    %cst_35 = arith.constant 0.000000e+00 : f32
    %49 = vector.broadcast %cst_35 : f32 to vector<8x128xf32>
    %50 = arith.maximumf %48, %49 : vector<8x128xf32>
    %51 = arith.truncf %50 : vector<8x128xf32> to vector<8x128xbf16>
    %c5 = arith.constant 5 : index
    %c0_36 = arith.constant 0 : index
    %c0_37 = arith.constant 0 : index
    %52 = vector.load %arg1[%c5, %c0_36, %c0_37] : memref<6x128x128xbf16, #tpu.memory_space<vmem>>, vector<1x128x128xbf16>
    %53 = vector.shape_cast %52 : vector<1x128x128xbf16> to vector<128x128xbf16>
    %cst_38 = arith.constant dense<0.000000e+00> : vector<8x128xf32>
    %54 = tpu.matmul %51, %53, %cst_38 {dimension_numbers = #tpu.dot_dimension_numbers<[1], [0], [0], [1], [0, 0, 1, 1], [], []>} : vector<8x128xbf16>, vector<128x128xbf16>, vector<8x128xf32> -> vector<8x128xf32>
    %c5_39 = arith.constant 5 : index
    %c0_40 = arith.constant 0 : index
    %c0_41 = arith.constant 0 : index
    %55 = vector.load %arg2[%c5_39, %c0_40, %c0_41] : memref<6x1x128xf32, #tpu.memory_space<vmem>>, vector<1x1x128xf32>
    %56 = vector.shape_cast %55 : vector<1x1x128xf32> to vector<1x128xf32>
    %57 = vector.broadcast %56 : vector<1x128xf32> to vector<8x128xf32>
    %58 = arith.addf %54, %57 : vector<8x128xf32>
    %cst_42 = arith.constant 0.000000e+00 : f32
    %59 = vector.broadcast %cst_42 : f32 to vector<8x128xf32>
    %60 = arith.maximumf %58, %59 : vector<8x128xf32>
    %c0_43 = arith.constant 0 : index
    %c0_44 = arith.constant 0 : index
    %61 = vector.load %arg3[%c0_43, %c0_44] : memref<8x128xf32, #tpu.memory_space<vmem>>, vector<8x128xf32>
    tpu.vector_store %arg3[%c0_43, %c0_44], %60 {strides = array<i32>} : memref<8x128xf32, #tpu.memory_space<vmem>>, vector<8x128xf32>,
    return
  }
}

</mosaic_0001>

<bundles_post_ra>
// kernel: drink_classifier_forward.1
= control target key start
LH: loop header
LB: loop body
LE: loop exit
PB: predicated region body
PF: predicated region fallthrough
CT: control target
= control target key end

     0   :  { %8 = vsyncpa [#allocation3], 0  ;;  %s916_s0 = inlined_call_operand.vmem [shape: f32[8,128], index: 0, kind: input, shape index: {}]   ;;  %s917_s1 = inlined_call_operand.hbm [shape: bf16[6,128,128], index: 1, kind: input, shape index: {}]   ;;  %s918_s2 = inlined_call_operand.vmem [shape: f32[6,1,128], index: 2, kind: input, shape index: {}]   ;;  %s919_s3 = inlined_call_operand.hbm [shape: f32[8,128], index: 3, kind: output, shape index: {}]  }
   0x1   :  { %9 = vsyncpa [#allocation4], 0  ;;  %s16_s14 = sshll.u32 %s917_s1, 4  ;;  %s865_s15 = smov [#allocation2]   ;;  %s17_s14 = int_to_ptr.hbm [resolvable:$true] %s16_s14 }
   0x2   :  { %s18_s16 = sshll.u32 %s865_s15, 4  ;;  %s866_s17 = smov 64   ;;  %s19_s16 = int_to_ptr.vmem [resolvable:$true] %s18_s16 }
   0x3   :  { %s867_s18 = smov 4  }
   0x4   :  { %24 = dma.hbm_to_vmem [thread:$0]  %s17_s14, 6144, %s19_s16, [#allocation3], %s866_s17, %s866_s17, %s867_s18  }
   0x5   :  { %861 = dma.done.wait [#allocation3], 6144  }
   0x6   :  { %862 = vsyncadd [#allocation3], 4294961152  ;;  %v762_v0 = vld [vmem:[#allocation2 + $0x38] sm:$0xff]  ;;  %v761_v1 = vld [vmem:[#allocation2 + $0x30] sm:$0xff]  ;;  %s868_s4 = smov [#allocation5]   ;;  %s548_s8 = sshll.u32 %s919_s3, 4  ;;  %s549_s8 = int_to_ptr.hbm [resolvable:$true] %s548_s8 }
   0x7   :  { %101 = vmatpush.bf16.msra.mxu0 %v762_v0  ;;  %v770_v2 = vld [vmem:[#allocation2 + $0x78] sm:$0xff]  ;;  %v760_v3 = vld [vmem:[#allocation2 + $0x28] sm:$0xff]  ;;  %v769_v4 = vld [vmem:[#allocation2 + $0x70] sm:$0xff]  ;;  %s546_s5 = sshll.u32 %s868_s4, 4  ;;  %s547_s5 = int_to_ptr.vmem [resolvable:$true] %s546_s5 }
   0x8   :  { %186 = vmatpush.bf16.msra.mxu1 %v770_v2  ;;  %v768_v5 = vld [vmem:[#allocation2 + $0x68] sm:$0xff]  ;;  %v759_v6 = vld [vmem:[#allocation2 + $0x20] sm:$0xff]  ;;  %v758_v8 = vld [vmem:[#allocation2 + $0x18] sm:$0xff] }
   0x9   :  { %v767_v7 = vld [vmem:[#allocation2 + $0x60] sm:$0xff]  ;;  %v766_v9 = vld [vmem:[#allocation2 + $0x58] sm:$0xff]  ;;  %v757_v10 = vld [vmem:[#allocation2 + $0x10] sm:$0xff] }
   0xa   :  { %v765_v11 = vld [vmem:[#allocation2 + $0x50] sm:$0xff]  ;;  %v756_v12 = vld [vmem:[#allocation2 + $0x8] sm:$0xff]  ;;  %v755_v13 = vld [vmem:[#allocation2] sm:$0xff] }
   0xb   :  { %102 = vmatpush.bf16.msra.mxu0 %v761_v1  ;;  %v31_v14 = vld [vmem:[%s916_s0] sm:$0xff]  ;;  %v764_v16 = vld [vmem:[#allocation2 + $0x48] sm:$0xff]  ;;  %v778_v18 = vld [vmem:[#allocation2 + $0xb8] sm:$0xff] }
   0xc   :  { %187 = vmatpush.bf16.msra.mxu1 %v769_v4  ;;  %v32_v15 = vpack.c.bf16 %v31_v14, %v31_v14  ;;  %v763_v17 = vld [vmem:[#allocation2 + $0x40] sm:$0xff]  ;;  %271 = vmatpush.bf16.msra.mxu2 %v778_v18  ;;  %v777_v19 = vld [vmem:[#allocation2 + $0xb0] sm:$0xff]  ;;  %v776_v20 = vld [vmem:[#allocation2 + $0xa8] sm:$0xff] }
   0xd   :  { %v775_v21 = vld [vmem:[#allocation2 + $0xa0] sm:$0xff]  ;;  %v774_v22 = vld [vmem:[#allocation2 + $0x98] sm:$0xff]  ;;  %v773_v23 = vld [vmem:[#allocation2 + $0x90] sm:$0xff] }
   0xe   :  { %v807_v24 = vld [vmem:[%s918_s2] ss:$0 sm:$0xff]  ;;  %v772_v30 = vld [vmem:[#allocation2 + $0x88] sm:$0xff]  ;;  %v786_v32 = vld [vmem:[#allocation2 + $0xf8] sm:$0xff] }
   0xf   :  { %103 = vmatpush.bf16.msra.mxu0 %v760_v3  ;;  %v771_v31 = vld [vmem:[#allocation2 + $0x80] sm:$0xff]  ;;  %356 = vmatpush.bf16.msra.mxu3 %v786_v32  ;;  %v785_v33 = vld [vmem:[#allocation2 + $0xf0] sm:$0xff]  ;;  %v784_v34 = vld [vmem:[#allocation2 + $0xe8] sm:$0xff] }
  0x10   :  { %188 = vmatpush.bf16.msra.mxu1 %v768_v5  ;;  %272 = vmatpush.bf16.msra.mxu2 %v777_v19  ;;  %v783_v35 = vld [vmem:[#allocation2 + $0xe0] sm:$0xff]  ;;  %v782_v36 = vld [vmem:[#allocation2 + $0xd8] sm:$0xff]  ;;  %v781_v37 = vld [vmem:[#allocation2 + $0xd0] sm:$0xff] }
  0x11   :  { %v808_v38 = vld [vmem:[%s918_s2 + $0x1] ss:$0 sm:$0xff]  ;;  %v780_v44 = vld [vmem:[#allocation2 + $0xc8] sm:$0xff]  ;;  %v794_v46 = vld [vmem:[#allocation2 + $0x138] sm:$0xff] }
  0x12   :  { %v779_v45 = vld [vmem:[#allocation2 + $0xc0] sm:$0xff]  ;;  %v793_v47 = vld [vmem:[#allocation2 + $0x130] sm:$0xff]  ;;  %v792_v48 = vld [vmem:[#allocation2 + $0x128] sm:$0xff] }
  0x13   :  { %104 = vmatpush.bf16.msra.mxu0 %v759_v6  ;;  %357 = vmatpush.bf16.msra.mxu3 %v785_v33  ;;  %v791_v49 = vld [vmem:[#allocation2 + $0x120] sm:$0xff]  ;;  %v790_v50 = vld [vmem:[#allocation2 + $0x118] sm:$0xff]  ;;  %v789_v51 = vld [vmem:[#allocation2 + $0x110] sm:$0xff] }
  0x14   :  { %189 = vmatpush.bf16.msra.mxu1 %v767_v7  ;;  %273 = vmatpush.bf16.msra.mxu2 %v776_v20  ;;  %v809_v52 = vld [vmem:[%s918_s2 + $0x2] ss:$0 sm:$0xff]  ;;  %v788_v58 = vld [vmem:[#allocation2 + $0x108] sm:$0xff]  ;;  %v802_v60 = vld [vmem:[#allocation2 + $0x178] sm:$0xff] }
  0x15   :  { %v787_v59 = vld [vmem:[#allocation2 + $0x100] sm:$0xff]  ;;  %v801_v61 = vld [vmem:[#allocation2 + $0x170] sm:$0xff]  ;;  %v800_v62 = vld [vmem:[#allocation2 + $0x168] sm:$0xff] }
  0x16   :  { %v799_v63 = vld [vmem:[#allocation2 + $0x160] sm:$0xff]  ;;  %v798_v0 = vld [vmem:[#allocation2 + $0x158] sm:$0xff]  ;;  %v797_v1 = vld [vmem:[#allocation2 + $0x150] sm:$0xff] }
  0x17   :  { %105 = vmatpush.bf16.msra.mxu0 %v758_v8  ;;  %358 = vmatpush.bf16.msra.mxu3 %v784_v34  ;;  %v810_v2 = vld [vmem:[%s918_s2 + $0x3] ss:$0 sm:$0xff]  ;;  %v796_v8 = vld [vmem:[#allocation2 + $0x148] sm:$0xff] }
  0x18   :  { %190 = vmatpush.bf16.msra.mxu1 %v766_v9  ;;  %274 = vmatpush.bf16.msra.mxu2 %v775_v21  ;;  %v795_v9 = vld [vmem:[#allocation2 + $0x140] sm:$0xff] }
  0x1b   :  { %106 = vmatpush.bf16.msra.mxu0 %v757_v10  ;;  %359 = vmatpush.bf16.msra.mxu3 %v783_v35  ;;  %v811_v10 = vld [vmem:[%s918_s2 + $0x4] ss:$0 sm:$0xff] }
  0x1c   :  { %191 = vmatpush.bf16.msra.mxu1 %v765_v11  ;;  %275 = vmatpush.bf16.msra.mxu2 %v774_v22 }
  0x1f   :  { %107 = vmatpush.bf16.msra.mxu0 %v756_v12  ;;  %360 = vmatpush.bf16.msra.mxu3 %v782_v36 }
  0x20   :  { %192 = vmatpush.bf16.msra.mxu1 %v764_v16  ;;  %276 = vmatpush.bf16.msra.mxu2 %v773_v23  ;;  %v812_v16 = vld [vmem:[%s918_s2 + $0x5] ss:$0 sm:$0xff] }
  0x23   :  { %108 = vmatpush.bf16.msra.mxu0 %v755_v13  ;;  %361 = vmatpush.bf16.msra.mxu3 %v781_v37 }
  0x24   :  { %193 = vmatpush.bf16.msra.mxu1 %v763_v17  ;;  %277 = vmatpush.bf16.msra.mxu2 %v772_v30 }
  0x26   :  { %109 = vmatmul.bf16.vlgmr.msra.gmra.mxu0 %v32_v15 }
  0x27   :  { %362 = vmatpush.bf16.msra.mxu3 %v780_v44  ;;  %441 = vmatpush.bf16.msrb.mxu0 %v794_v46 }
  0x28   :  { %278 = vmatpush.bf16.msra.mxu2 %v771_v31  ;;  %526 = vmatpush.bf16.msrb.mxu1 %v802_v60 }
  0x2b   :  { %363 = vmatpush.bf16.msra.mxu3 %v779_v45  ;;  %442 = vmatpush.bf16.msrb.mxu0 %v793_v47 }
  0x2c   :  { %527 = vmatpush.bf16.msrb.mxu1 %v801_v61 }
  0x2f   :  { %443 = vmatpush.bf16.msrb.mxu0 %v792_v48 }
  0x30   :  { %528 = vmatpush.bf16.msrb.mxu1 %v800_v62 }
  0x33   :  { %444 = vmatpush.bf16.msrb.mxu0 %v791_v49 }
  0x34   :  { %529 = vmatpush.bf16.msrb.mxu1 %v799_v63 }
  0x37   :  { %445 = vmatpush.bf16.msrb.mxu0 %v790_v50 }
  0x38   :  { %530 = vmatpush.bf16.msrb.mxu1 %v798_v0 }
  0x3b   :  { %446 = vmatpush.bf16.msrb.mxu0 %v789_v51 }
  0x3c   :  { %531 = vmatpush.bf16.msrb.mxu1 %v797_v1 }
  0x3f   :  { %447 = vmatpush.bf16.msrb.mxu0 %v788_v58 }
  0x40   :  { %532 = vmatpush.bf16.msrb.mxu1 %v796_v8 }
  0x43   :  { %448 = vmatpush.bf16.msrb.mxu0 %v787_v59 }
  0x44   :  { %533 = vmatpush.bf16.msrb.mxu1 %v795_v9 }
  0xa3   :  { %v110_v25 = vpop.f32.mrf.mxu0 }
  0xa4   :  { %v111_v26 = vadd.f32 %v807_v24, %v110_v25 }
  0xa6   :  { %v114_v27 = vmax.f32 %v111_v26, 0.0 }
  0xa8   :  { %v115_v28 = vpack.c.bf16 %v114_v27, %v114_v27 }
  0xaa   :  { %194 = vmatmul.bf16.vlgmr.msra.gmra.mxu1 %v115_v28 }
  0xab   :  { %v112_v29 = vpop.f32.mrf.mxu0 }
 0x127   :  { %v195_v39 = vpop.f32.mrf.mxu1 }
 0x128   :  { %v196_v40 = vadd.f32 %v808_v38, %v195_v39 }
 0x12a   :  { %v199_v41 = vmax.f32 %v196_v40, 0.0 }
 0x12c   :  { %v200_v42 = vpack.c.bf16 %v199_v41, %v199_v41 }
 0x12e   :  { %279 = vmatmul.bf16.vlgmr.msra.gmra.mxu2 %v200_v42 }
 0x12f   :  { %v197_v43 = vpop.f32.mrf.mxu1 }
 0x1b1   :  { %v280_v53 = vpop.f32.mrf.mxu2 }
 0x1b2   :  { %v281_v54 = vadd.f32 %v809_v52, %v280_v53 }
 0x1b4   :  { %v284_v55 = vmax.f32 %v281_v54, 0.0 }
 0x1b6   :  { %v285_v56 = vpack.c.bf16 %v284_v55, %v284_v55 }
 0x1b8   :  { %364 = vmatmul.bf16.vlgmr.msra.gmra.mxu3 %v285_v56 }
 0x1b9   :  { %v282_v57 = vpop.f32.mrf.mxu2 }
 0x23b   :  { %v365_v3 = vpop.f32.mrf.mxu3 }
 0x23c   :  { %v366_v4 = vadd.f32 %v810_v2, %v365_v3 }
 0x23e   :  { %v369_v5 = vmax.f32 %v366_v4, 0.0 }
 0x240   :  { %v370_v6 = vpack.c.bf16 %v369_v5, %v369_v5 }
 0x242   :  { %449 = vmatmul.bf16.vlgmr.msrb.gmra.mxu0 %v370_v6 }
 0x243   :  { %v367_v7 = vpop.f32.mrf.mxu3 }
 0x2bf   :  { %v450_v11 = vpop.f32.mrf.mxu0 }
 0x2c0   :  { %v451_v12 = vadd.f32 %v811_v10, %v450_v11 }
 0x2c2   :  { %v454_v13 = vmax.f32 %v451_v12, 0.0 }
 0x2c4   :  { %v455_v14 = vpack.c.bf16 %v454_v13, %v454_v13 }
 0x2c6   :  { %534 = vmatmul.bf16.vlgmr.msrb.gmra.mxu1 %v455_v14 }
 0x2c7   :  { %v452_v15 = vpop.f32.mrf.mxu0 }
 0x343   :  { %v535_v17 = vpop.f32.mrf.mxu1 }
 0x344   :  { %v536_v18 = vadd.f32 %v812_v16, %v535_v17 }
 0x346   :  { %v539_v19 = vmax.f32 %v536_v18, 0.0 }
 0x348   :  { %540 = vst [vmem:[#allocation5] sm:$0xff] %v539_v19 }
 0x349   :  { %551 = dma.vmem_to_hbm [thread:$0]  %s547_s5, 128, %s549_s8, [#allocation4]  }
 0x34b   :  { %v537_v20 = vpop.f32.mrf.mxu1 }
 0x34c   :  { %863 = dma.done.wait [#allocation4], 128  }
 0x34d   :  { %864 = vsyncadd [#allocation4], 4294967168 }
 0x34e   :  { %556 = vsyncpa [#allocation3], 1 }
 0x34f   :  { %557 = vsyncpa [#allocation4], 1 }

</bundles_post_ra>
